<compile_context>
chip_gen: v7x
topology: tpu7x:2x2x1
jax: 0.10.0
libtpu: 0.0.40
codegen_flags: <defaults>
</compile_context>

<pallas_src>
import math
import jax
import jax.numpy as jnp
from jax.experimental import pallas as pl
from jax.experimental.pallas import tpu as pltpu

NOISE_SCALE = 5000.0


def _diff_pair_kernel(posact_ref, geom_ref, bias_ref,
                      w1_ref, b1_ref, w2g_ref, out_ref):
    # pair_FG_encoder layer 1 + ReLU (layer 2 & Wgeom folded into w2g).
    geom = geom_ref[0].astype(jnp.float32)                        # [TMP, P*Ci]
    h = jnp.dot(geom, w1_ref[...], preferred_element_type=jnp.float32) + b1_ref[...]
    h = jnp.maximum(h, 0.0)                                       # [TMP, P*FG]

    # pair_act = posact + h @ (W2@Wgeom) + (b_act + b2@Wgeom + e0 + t_emb)
    act = (posact_ref[0].astype(jnp.float32)
           + jnp.dot(h, w2g_ref[...], preferred_element_type=jnp.float32)
           + bias_ref[0])                                         # [TMP, P*C]
    out_ref[0] = act.astype(out_ref.dtype)


def _block_diag(w, pack):
    k, n = w.shape
    out = jnp.zeros((pack * k, pack * n), w.dtype)
    for p in range(pack):
        out = out.at[p * k:(p + 1) * k, p * n:(p + 1) * n].set(w)
    return out


def _round_up(x, m):
    return (x + m - 1) // m * m


def diff_pair_encoder_pallas(params, pair_res_rel, pair_chain_rel,
                             geom_pair, t, condition):
    B, L, _ = pair_res_rel.shape
    LL = L * L
    C = params['b_act'].shape[-1]
    Ci = geom_pair.shape[-1]
    FG = params['w2'].shape[-1]

    # Lane-packing factor: PACK pair rows share one 128-lane output row.
    PACK = 128 // C if (C <= 128 and 128 % C == 0) else 1

    # Row tiling (packed domain): sublane-aligned, padded if ragged.
    LLP = -(-LL // PACK)                      # packed rows (ceil)
    TMP = min(2048, _round_up(LLP, 8))        # packed rows per grid step
    LLP_pad = _round_up(LLP, TMP)
    ROWS = LLP_pad * PACK                     # flat pair rows after padding

    # ---- algebraic weight folding (tiny, wrapper-side) ----
    w2g = params['w2'] @ params['w_geom']                                   # (FG, C)
    e0 = params['cond_table'][0]
    e1 = params['cond_table'][1]
    bias0 = params['b_act'][0] + params['b2'][0] @ params['w_geom'] + e0    # (C,)

    w1_bd = _block_diag(params['w1'], PACK).astype(jnp.float32)             # (P*Ci, P*FG)
    w2g_bd = _block_diag(w2g, PACK).astype(jnp.float32)                     # (P*FG, P*C)
    b1_t = jnp.tile(params['b1'], (1, PACK)).astype(jnp.float32)            # (1, P*FG)

    # ---- per-batch bias = folded bias + ContinousNoiseSchedual t-embedding ----
    noise = t
    if noise.ndim > 1:
        noise = jnp.squeeze(noise, -1)
    expo = NOISE_SCALE * noise[:, None] * params['nsched_emb'][None, :]
    t_emb = jnp.concatenate([jnp.sin(expo), jnp.cos(expo)], axis=-1)        # [B, C]
    b_batch = jnp.tile(bias0[None, :] + t_emb, (1, PACK))
    b_batch = b_batch.reshape(B, 1, PACK * C).astype(jnp.float32)

    # ---- pos (+cond) contribution pre-projected into ONE small lookup table ----
    res_emb, chain_emb = params['res_emb'], params['chain_emb']
    NR, NC = res_emb.shape[0], chain_emb.shape[0]
    pos_table = jnp.concatenate([jnp.repeat(res_emb, NC, axis=0),
                                 jnp.tile(chain_emb, (NR, 1))], axis=-1)    # (NR*NC, Cpos)
    posact0 = pos_table @ params['w_pos']                                   # (NR*NC, C)
    posact_tbl = jnp.stack([posact0, posact0 + (e1 - e0)[None, :]], axis=1)
    posact_tbl = posact_tbl.reshape(NR * NC * 2, C).astype(jnp.bfloat16)

    pair_cond = (condition[:, :, None].astype(jnp.int32)
                 * condition[:, None, :].astype(jnp.int32))                 # [B,L,L] in {0,1}
    idx = (pair_res_rel * NC + pair_chain_rel) * 2 + pair_cond              # [B,L,L]
    posact_g = jnp.take(posact_tbl, idx, axis=0)                            # [B,L,L,C] bf16

    # ---- pack input streams (bf16 for HBM traffic; free contiguous reshapes) ----
    def pack_rows(x, ch):
        x = x.reshape(B, LL, ch)
        if ROWS != LL:
            x = jnp.pad(x, ((0, 0), (0, ROWS - LL), (0, 0)))
        return x.reshape(B, LLP_pad, PACK * ch)

    posact_packed = pack_rows(posact_g, C)                                  # (B, LLP_pad, P*C)
    geom_packed = pack_rows(geom_pair.astype(jnp.bfloat16), Ci)             # (B, LLP_pad, P*Ci)

    full2 = lambda b, i: (0, 0)
    out = pl.pallas_call(
        _diff_pair_kernel,
        out_shape=jax.ShapeDtypeStruct((B, LLP_pad, PACK * C), jnp.float32),
        grid_spec=pltpu.PrefetchScalarGridSpec(
            num_scalar_prefetch=0,
            grid=(B, LLP_pad // TMP),
            in_specs=[
                pl.BlockSpec((1, TMP, PACK * C), lambda b, i: (b, i, 0)),   # posact(+cond)
                pl.BlockSpec((1, TMP, PACK * Ci), lambda b, i: (b, i, 0)),  # geom
                pl.BlockSpec((1, 1, PACK * C), lambda b, i: (b, 0, 0)),     # per-batch bias
                pl.BlockSpec((PACK * Ci, PACK * FG), full2),                # w1 (blockdiag)
                pl.BlockSpec((1, PACK * FG), full2),                        # b1 (tiled)
                pl.BlockSpec((PACK * FG, PACK * C), full2),                 # w2@w_geom (blockdiag)
            ],
            out_specs=pl.BlockSpec((1, TMP, PACK * C), lambda b, i: (b, i, 0)),
        ),
        compiler_params=pltpu.CompilerParams(
            dimension_semantics=("parallel", "parallel")),
    )(posact_packed, geom_packed, b_batch, w1_bd, b1_t, w2g_bd)

    out = out.reshape(B, LLP_pad * PACK, C)[:, :LL]
    return out.reshape(B, L, L, C)


def diff_pair_encoder_ref(params, pair_res_rel, pair_chain_rel,
                          geom_pair, t, condition):
    """Pure-JAX reference mirroring the PyTorch forward."""
    res_pos = params['res_emb'][pair_res_rel]
    chain_pos = params['chain_emb'][pair_chain_rel]
    pair_pos = jnp.concatenate([res_pos, chain_pos], -1)
    h = jnp.maximum(geom_pair @ params['w1'] + params['b1'][0], 0.0)
    fg = h @ params['w2'] + params['b2'][0]
    pair = jnp.concatenate([pair_pos, fg], -1)
    w_act = jnp.concatenate([params['w_pos'], params['w_geom']], axis=0)
    act = pair @ w_act + params['b_act'][0]
    noise = jnp.squeeze(t, -1)
    expo = NOISE_SCALE * noise[:, None] * params['nsched_emb'][None, :]
    t_emb = jnp.concatenate([jnp.sin(expo), jnp.cos(expo)], -1)
    act = act + t_emb[:, None, None, :]
    pc = (condition[:, :, None] * condition[:, None, :]).astype(jnp.int32)
    act = act + params['cond_table'][pc]
    return act


def make_params(key, *, pair_res_rel=32, pair_chain_rel=2,
                pair_res_channel=16, pair_chain_channel=16,
                pair_FG_channel=32, pair_channel=32, input_channel=16):
    ks = jax.random.split(key, 10)
    s = 0.05
    half = pair_channel // 2
    nsched = jnp.exp(jnp.arange(half, dtype=jnp.float32)
                     * (-math.log(10000.0) / float(half - 1)))
    return {
        'res_emb': s * jax.random.normal(ks[0], (pair_res_rel * 2 + 2, pair_res_channel), jnp.float32),
        'chain_emb': s * jax.random.normal(ks[1], (pair_chain_rel * 2 + 2, pair_chain_channel), jnp.float32),
        'w1': s * jax.random.normal(ks[2], (input_channel, pair_FG_channel), jnp.float32),
        'b1': s * jax.random.normal(ks[3], (1, pair_FG_channel), jnp.float32),
        'w2': s * jax.random.normal(ks[4], (pair_FG_channel, pair_FG_channel), jnp.float32),
        'b2': s * jax.random.normal(ks[5], (1, pair_FG_channel), jnp.float32),
        'w_pos': s * jax.random.normal(ks[6], (pair_res_channel + pair_chain_channel, pair_channel), jnp.float32),
        'w_geom': s * jax.random.normal(ks[7], (pair_FG_channel, pair_channel), jnp.float32),
        'b_act': s * jax.random.normal(ks[8], (1, pair_channel), jnp.float32),
        'cond_table': s * jax.random.normal(ks[9], (2, pair_channel), jnp.float32),
        'nsched_emb': nsched,
    }


if __name__ == "__main__":
    key = jax.random.PRNGKey(0)
    B, L = 2, 8
    # config: rbf_encode=True (num_rbf=13), tri_encode=False -> input_channel = 4 + 12 = 16
    Ci = 16
    params = make_params(key, input_channel=Ci)

    k1, k2, k3, k4, k5 = jax.random.split(key, 5)
    pair_res_rel = jax.random.randint(k1, (B, L, L), 0, 32 * 2 + 2)
    pair_chain_rel = jax.random.randint(k2, (B, L, L), 0, 2 * 2 + 2)
    geom_pair = jax.random.normal(k3, (B, L, L, Ci), jnp.float32)
    t = jax.random.uniform(k4, (B, 1), jnp.float32)
    condition = jax.random.randint(k5, (B, L), 0, 2)

    out = diff_pair_encoder_pallas(params, pair_res_rel, pair_chain_rel,
                                   geom_pair, t, condition)
    out = jax.block_until_ready(out)

    ref = diff_pair_encoder_ref(params, pair_res_rel, pair_chain_rel,
                                geom_pair, t, condition)
    assert out.shape == (B, L, L, 32), out.shape
    assert jnp.allclose(out, ref, rtol=2e-2, atol=2e-2), \
        float(jnp.max(jnp.abs(out - ref)))
    print("KERNEL_OK")
</pallas_src>

<mosaic_0001>
module attributes {stable_mosaic.version = 11 : i64} {
  func.func @_diff_pair_kernel(%arg0: i32, %arg1: i32, %arg2: memref<1x16x128xbf16, #tpu.memory_space<vmem>>, %arg3: memref<1x16x64xbf16, #tpu.memory_space<vmem>>, %arg4: memref<1x1x128xf32, #tpu.memory_space<vmem>>, %arg5: memref<64x128xf32, #tpu.memory_space<vmem>>, %arg6: memref<1x128xf32, #tpu.memory_space<vmem>>, %arg7: memref<128x128xf32, #tpu.memory_space<vmem>>, %arg8: memref<1x16x128xf32, #tpu.memory_space<vmem>>) attributes {dimension_semantics = [#tpu.dimension_semantics<parallel>, #tpu.dimension_semantics<parallel>], iteration_bounds = array<i64: 2, 1>, scalar_prefetch = 0 : i64, scratch_operands = 0 : i64, tpu.core_type = #tpu.core_type<tc>, window_params = [{transform_indices = @transform_0, window_bounds = array<i64: 1, 16, 128>}, {transform_indices = @transform_1, window_bounds = array<i64: 1, 16, 64>}, {transform_indices = @transform_2, window_bounds = array<i64: 1, 1, 128>}, {pipeline_mode = #tpu.pipeline_mode<synchronous>, transform_indices = @transform_3, window_bounds = array<i64: 64, 128>}, {pipeline_mode = #tpu.pipeline_mode<synchronous>, transform_indices = @transform_4, window_bounds = array<i64: 1, 128>}, {pipeline_mode = #tpu.pipeline_mode<synchronous>, transform_indices = @transform_5, window_bounds = array<i64: 128, 128>}, {transform_indices = @transform_6, window_bounds = array<i64: 1, 16, 128>}]} {
    %c0 = arith.constant 0 : index
    %c0_0 = arith.constant 0 : index
    %c0_1 = arith.constant 0 : index
    %0 = vector.load %arg3[%c0, %c0_0, %c0_1] : memref<1x16x64xbf16, #tpu.memory_space<vmem>>, vector<1x16x64xbf16>
    %1 = vector.shape_cast %0 : vector<1x16x64xbf16> to vector<16x64xbf16>
    %2 = arith.extf %1 : vector<16x64xbf16> to vector<16x64xf32>
    %c0_2 = arith.constant 0 : index
    %c0_3 = arith.constant 0 : index
    %3 = vector.load %arg5[%c0_2, %c0_3] : memref<64x128xf32, #tpu.memory_space<vmem>>, vector<64x128xf32>
    %cst = arith.constant dense<0.000000e+00> : vector<16x128xf32>
    %4 = tpu.matmul %2, %3, %cst {dimension_numbers = #tpu.dot_dimension_numbers<[1], [0], [0], [1], [0, 0, 1, 1], [], []>} : vector<16x64xf32>, vector<64x128xf32>, vector<16x128xf32> -> vector<16x128xf32>
    %c0_4 = arith.constant 0 : index
    %c0_5 = arith.constant 0 : index
    %5 = vector.load %arg6[%c0_4, %c0_5] : memref<1x128xf32, #tpu.memory_space<vmem>>, vector<1x128xf32>
    %6 = vector.broadcast %5 : vector<1x128xf32> to vector<16x128xf32>
    %7 = arith.addf %4, %6 : vector<16x128xf32>
    %cst_6 = arith.constant 0.000000e+00 : f32
    %8 = vector.broadcast %cst_6 : f32 to vector<16x128xf32>
    %9 = arith.maximumf %7, %8 : vector<16x128xf32>
    %c0_7 = arith.constant 0 : index
    %c0_8 = arith.constant 0 : index
    %c0_9 = arith.constant 0 : index
    %10 = vector.load %arg2[%c0_7, %c0_8, %c0_9] : memref<1x16x128xbf16, #tpu.memory_space<vmem>>, vector<1x16x128xbf16>
    %11 = vector.shape_cast %10 : vector<1x16x128xbf16> to vector<16x128xbf16>
    %12 = arith.extf %11 : vector<16x128xbf16> to vector<16x128xf32>
    %c0_10 = arith.constant 0 : index
    %c0_11 = arith.constant 0 : index
    %13 = vector.load %arg7[%c0_10, %c0_11] : memref<128x128xf32, #tpu.memory_space<vmem>>, vector<128x128xf32>
    %cst_12 = arith.constant dense<0.000000e+00> : vector<16x128xf32>
    %14 = tpu.matmul %9, %13, %cst_12 {dimension_numbers = #tpu.dot_dimension_numbers<[1], [0], [0], [1], [0, 0, 1, 1], [], []>} : vector<16x128xf32>, vector<128x128xf32>, vector<16x128xf32> -> vector<16x128xf32>
    %15 = arith.addf %12, %14 : vector<16x128xf32>
    %c0_13 = arith.constant 0 : index
    %c0_14 = arith.constant 0 : index
    %c0_15 = arith.constant 0 : index
    %16 = vector.load %arg4[%c0_13, %c0_14, %c0_15] : memref<1x1x128xf32, #tpu.memory_space<vmem>>, vector<1x1x128xf32>
    %17 = vector.shape_cast %16 : vector<1x1x128xf32> to vector<1x128xf32>
    %18 = vector.broadcast %17 : vector<1x128xf32> to vector<16x128xf32>
    %19 = arith.addf %15, %18 : vector<16x128xf32>
    %c0_16 = arith.constant 0 : index
    %c0_17 = arith.constant 0 : index
    %c0_18 = arith.constant 0 : index
    %20 = vector.load %arg8[%c0_16, %c0_17, %c0_18] : memref<1x16x128xf32, #tpu.memory_space<vmem>>, vector<1x16x128xf32>
    %21 = vector.shape_cast %20 : vector<1x16x128xf32> to vector<16x128xf32>
    %22 = vector.shape_cast %19 : vector<16x128xf32> to vector<1x16x128xf32>
    tpu.vector_store %arg8[%c0_16, %c0_17, %c0_18], %22 {strides = array<i32>} : memref<1x16x128xf32, #tpu.memory_space<vmem>>, vector<1x16x128xf32>,
    return
  }
  func.func @transform_0(%arg0: i32, %arg1: i32) -> (i32, i32, i32) {
    %c0_i32 = arith.constant 0 : i32
    %c0_i32_0 = arith.constant 0 : i32
    return %arg0, %arg1, %c0_i32 : i32, i32, i32
  }
  func.func @transform_1(%arg0: i32, %arg1: i32) -> (i32, i32, i32) {
    %c0_i32 = arith.constant 0 : i32
    %c0_i32_0 = arith.constant 0 : i32
    return %arg0, %arg1, %c0_i32 : i32, i32, i32
  }
  func.func @transform_2(%arg0: i32, %arg1: i32) -> (i32, i32, i32) {
    %c0_i32 = arith.constant 0 : i32
    %c0_i32_0 = arith.constant 0 : i32
    %c0_i32_1 = arith.constant 0 : i32
    return %arg0, %c0_i32, %c0_i32_0 : i32, i32, i32
  }
  func.func @transform_3(%arg0: i32, %arg1: i32) -> (i32, i32) {
    %c0_i32 = arith.constant 0 : i32
    %c0_i32_0 = arith.constant 0 : i32
    %c0_i32_1 = arith.constant 0 : i32
    return %c0_i32, %c0_i32_0 : i32, i32
  }
  func.func @transform_4(%arg0: i32, %arg1: i32) -> (i32, i32) {
    %c0_i32 = arith.constant 0 : i32
    %c0_i32_0 = arith.constant 0 : i32
    %c0_i32_1 = arith.constant 0 : i32
    return %c0_i32, %c0_i32_0 : i32, i32
  }
  func.func @transform_5(%arg0: i32, %arg1: i32) -> (i32, i32) {
    %c0_i32 = arith.constant 0 : i32
    %c0_i32_0 = arith.constant 0 : i32
    %c0_i32_1 = arith.constant 0 : i32
    return %c0_i32, %c0_i32_0 : i32, i32
  }
  func.func @transform_6(%arg0: i32, %arg1: i32) -> (i32, i32, i32) {
    %c0_i32 = arith.constant 0 : i32
    %c0_i32_0 = arith.constant 0 : i32
    return %arg0, %arg1, %c0_i32 : i32, i32, i32
  }
}

</mosaic_0001>

<bundles_post_ra>
// kernel: tpu_custom_call.1
= control target key start
LH: loop header
LB: loop body
LE: loop exit
PB: predicated region body
PF: predicated region fallthrough
CT: control target
= control target key end

     0   :  { %s1588_s0 = inlined_call_operand.hbm [shape: bf16[2,16,128], index: 0, kind: input, shape index: {}]   ;;  %s1589_s1 = inlined_call_operand.hbm [shape: bf16[2,16,64], index: 1, kind: input, shape index: {}]   ;;  %s1590_s2 = inlined_call_operand.vmem [shape: f32[2,1,128], index: 2, kind: input, shape index: {}]   ;;  %s1591_s3 = inlined_call_operand.hbm [shape: f32[64,128], index: 3, kind: input, shape index: {}]   ;;  %s1592_s4 = inlined_call_operand.vmem [shape: f32[1,128], index: 4, kind: input, shape index: {}]   ;;  %s1593_s5 = inlined_call_operand.hbm [shape: f32[128,128], index: 5, kind: input, shape index: {}]   ;;  %s1594_s6 = inlined_call_operand.hbm [shape: f32[2,16,128], index: 6, kind: output, shape index: {}]  }
   0x1   :  { %1600 = sst [smem:[#allocation18_spill]] %s1588_s0 }
   0x2   :  { %1601 = sst [smem:[#allocation19_spill]] %s1591_s3 }
   0x3   :  { %1602 = sst [smem:[#allocation20_spill]] %s1593_s5 }
   0x4   :  { %11 = vsyncpa [#allocation3], 0 }
   0x5   :  { %13 = vsyncpa [#allocation3 + $0x1], 0 }
   0x6   :  { %14 = vsyncpa [#allocation6], 0 }
   0x7   :  { %16 = vsyncpa [#allocation6 + $0x1], 0 }
   0x8   :  { %17 = vsyncpa [#allocation9], 0 }
   0x9   :  { %18 = vsyncpa [#allocation4], 0 }
   0xa   :  { %20 = vsyncpa [#allocation4 + $0x1], 0  ;;  %s1266_s21 = smov 0   ;;  %s1268_s22 = smov 0  }
   0xb   :  { %s1270_s23 = smov 0   ;;  %s1272_s24 = smov 0  }
   0xc   :  { %s1274_s25 = smov 0   ;;  %s1276_s26 = smov 0  }
   0xd LB: > { %s1297_s27 = sadd.s32 4294967295, %s1218_s26   ;;  %s747_s28 = sadd.s32 4294967294, %s1218_s26   ;;  %s1218_s26 = sphi %s1276_s26, %s26_s26   ;;  %s1214_s25 = sphi %s1274_s25, %s1630_s25   ;;  %s1210_s24 = sphi %s1272_s24, %s1629_s24   ;;  %s1206_s23 = sphi %s1270_s23, %s1628_s23   ;;  %s1202_s22 = sphi %s1268_s22, %s1627_s22   ;;  %s1198_s21 = sphi %s1266_s21, %s1626_s21  }
   0xe   : > { %p60_p0 = scmp.ne.s32.totalorder %s1202_s22, %s1198_s21  ;;  %p1595_p1 = scmp.eq.s32.totalorder %s1297_s27, 0 }
   0xf   : > { %p209_p3 = scmp.eq.s32.totalorder %s747_s28, 1  ;;  %p748_p5 = scmp.ge.s32.totalorder %s1218_s26, 1 }
  0x10   : > { %p1306_p4 = por %p1595_p1, %p60_p0  ;;  %p216_p7 = scmp.lt.s32.totalorder %s1218_s26, 3 }
  0x11   : > { %p1311_p6 = por %p209_p3, %p60_p0  ;;  %s1220_s8 = smov [#allocation7]  }
  0x12   : > { %s1603_s29 = scalar_select %p1306_p4, 1, 0 }
  0x13   : > { %s1604_s30 = scalar_select %p1311_p6, 1, 0 }
  0x14   : > { %p1316_p8 = pnand %p748_p5, %p216_p7  ;;  %s228_s9 = sshll.u32 %s1220_s8, 4  ;;  %s1320_s9 = int_to_ptr.vmem [resolvable:$true] %s228_s9 }
  0x15   : > { %s1221_s11 = smov [#allocation8]   ;;  %s1607_s3 = sld [smem:[#allocation19_spill]] }
  0x16   : > { %p928_p9 = pneg %p1316_p8  ;;  %s244_s12 = sshll.u32 %s1221_s11, 4  ;;  %s1331_s12 = int_to_ptr.vmem [resolvable:$true] %s244_s12 }
  0x18   : > { %p1327_p11 = pnand %p928_p9, %p1595_p1 }
  0x1a   : > { %p1010_p13 = pneg %p1327_p11 }
  0x1b   : > { %s1008_s15 = scalar_lea.hbm %s1607_s3, 1024 }
  0x1c   : > { %p1009_p12 = scmp.ne.s32.totalorder %s1607_s3, %s1008_s15  ;;  %p1015_p5 = scmp.lt.u32.totalorder %s1008_s15, %s1607_s3 }
  0x1e   : > { %p1011_p0 = pnand %p1010_p13, %p1009_p12 }
  0x20   : > { %p1012_p3 = pneg %p1011_p0 }
  0x22   : > { %p1017_p7 = pnand %p1015_p5, %p1012_p3 }
  0x24   : > { %1020 = shalt.err (!%p1017_p7)
}
  0x25   : > { %s1021_s20 = scalar_lea.vmem %s1320_s9, 1024  ;;  %p1029_p2 = scmp.lt.s32.totalorder %s1320_s9, %s1320_s9 }
  0x26   : > { %p1022_p9 = scmp.ne.s32.totalorder %s1320_s9, %s1021_s20  ;;  %p1030_p12 = scmp.lt.s32.totalorder %s1021_s20, %s1021_s20 }
  0x28   : > { %p1024_p10 = pnand %p1022_p9, %p1010_p13  ;;  %p1031_p0 = por %p1030_p12, %p1029_p2 }
  0x2a   : > { %p1025_p1 = pneg %p1024_p10 }
  0x2c   : > { %p1032_p6 = pnand %p1031_p0, %p1025_p1 }
  0x2e   : > { %1035 = shalt.err (!%p1032_p6)
}
  0x2f   : > { %s1222_s28 = smov 128   ;;  %s1223_s8 = smov 8  }
  0x30   : > { %931 = dma.hbm_to_vmem [thread:$0]  (!%p1327_p11), %s1607_s3, 1024, %s1320_s9, [#allocation6], %s1222_s28, %s1222_s28, %s1223_s8  }
  0x31   : > { %s1608_s5 = sld [smem:[#allocation20_spill]] }
  0x37   : > { %s1036_s16 = scalar_lea.hbm %s1608_s5, 2048 }
  0x38   : > { %p1037_p2 = scmp.ne.s32.totalorder %s1608_s5, %s1036_s16  ;;  %p1043_p10 = scmp.lt.u32.totalorder %s1036_s16, %s1608_s5 }
  0x3a   : > { %p1039_p1 = pnand %p1037_p2, %p1010_p13 }
  0x3c   : > { %p1040_p6 = pneg %p1039_p1 }
  0x3e   : > { %p1045_p3 = pnand %p1043_p10, %p1040_p6 }
  0x40   : > { %1048 = shalt.err (!%p1045_p3)
}
  0x41   : > { %s1049_s9 = scalar_lea.vmem %s1331_s12, 2048  ;;  %p1057_p12 = scmp.lt.s32.totalorder %s1331_s12, %s1331_s12 }
  0x42   : > { %p1050_p5 = scmp.ne.s32.totalorder %s1331_s12, %s1049_s9  ;;  %p1058_p0 = scmp.lt.s32.totalorder %s1049_s9, %s1049_s9 }
  0x44   : > { %p1052_p7 = pnand %p1050_p5, %p1010_p13  ;;  %p1059_p2 = por %p1058_p0, %p1057_p12 }
  0x46   : > { %p1053_p9 = pneg %p1052_p7 }
  0x48   : > { %p1060_p1 = pnand %p1059_p2, %p1053_p9 }
  0x4a   : > { %1063 = shalt.err (!%p1060_p1)
}
  0x4b   : > { %934 = dma.hbm_to_vmem [thread:$0]  (!%p1327_p11), %s1608_s5, 2048, %s1331_s12, [#allocation9], %s1222_s28, %s1222_s28, %s1223_s8  }
  0x4c   : > { %s38_s14 = sadd.s32 1, %s1214_s25  ;;  %s47_s15 = sadd.s32 1, %s1206_s23 }
  0x4d   : > { %p40_p13 = scmp.ge.s32.totalorder %s38_s14, 2  ;;  %p54_p6 = scmp.ne.s32.totalorder %s1206_s23, %s1202_s22 }
  0x4e   : > { %p55_p10 = scmp.eq.s32.totalorder %s1218_s26, 0  ;;  %p948_p3 = scmp.lt.s32.totalorder %s1218_s26, 2 }
  0x4f   : > { %s1632_s14 = smov (%p40_p13, %s38_s14), 0  ;;  %p1610_p7 = scmp.eq.s32.totalorder %s1297_s27, 1 }
  0x50   : > { %1609 = sst [smem:[#allocation16_spill]] %s1632_s14  ;;  %p56_p5 = por %p55_p10, %p54_p6 }
  0x51   : > { %p1395_p9 = por %p1610_p7, %p54_p6  ;;  %s42_s16 = ssub.s32 %s1214_s25, %s1632_s14 }
  0x52   : > { %s258_s17 = sand.u32 1, %s1206_s23   ;;  %p45_p11 = scmp.eq.s32.totalorder %s42_s16, 0 }
  0x53   : > { %s1611_s10 = scalar_select %p1395_p9, 1, 0 }
  0x54   : > { %s1402_s12 = sshll.u32 %s258_s17, 3  ;;  %s1596_s28 = sshll.u32 %s1214_s25, 7 }
  0x55   : > { %s1406_s8 = scalar_select %p45_p11, %s1206_s23, %s47_s15  }
  0x56   : > { %s1613_s0 = sld [smem:[#allocation18_spill]]  ;;  %s262_s9 = scalar_lea.vmem [#allocation2], %s1402_s12 }
  0x57   : > { %1612 = sst [smem:[#allocation17_spill]] %s1406_s8  ;;  %s271_s11 = sshll.u32 %s262_s9, 4  ;;  %s1422_s11 = int_to_ptr.vmem [resolvable:$true] %s271_s11 }
  0x58   : > { %p1418_p12 = pnand %p948_p3, %p56_p5  ;;  %s1424_s15 = scalar_lea.sflag [#allocation3], %s258_s17 }
  0x5a   : > { %p1066_p2 = pneg %p1418_p12 }
  0x5c   : > { %s1413_s20 = scalar_lea.hbm %s1613_s0, %s1596_s28  ;;  %s1069_s9 = scalar_lea.hbm %s1613_s0, 256 }
  0x5d   : > { %s1064_s16 = scalar_lea.hbm %s1413_s20, 128  ;;  %p1070_p6 = scmp.lt.u32.totalorder %s1413_s20, %s1613_s0 }
  0x5e   : > { %p1065_p0 = scmp.ne.s32.totalorder %s1413_s20, %s1064_s16  ;;  %p1071_p10 = scmp.lt.u32.totalorder %s1069_s9, %s1064_s16 }
  0x5f   : > { %p1073_p5 = scmp.lt.u32.totalorder %s1064_s16, %s1413_s20 }
  0x60   : > { %p1067_p1 = pnand %p1066_p2, %p1065_p0  ;;  %p1072_p3 = por %p1071_p10, %p1070_p6 }
  0x62   : > { %p1068_p13 = pneg %p1067_p1  ;;  %p1074_p7 = por %p1073_p5, %p1072_p3 }
  0x64   : > { %p1075_p11 = pnand %p1074_p7, %p1068_p13 }
  0x66   : > { %1078 = shalt.err (!%p1075_p11)
}
  0x67   : > { %s1079_s17 = scalar_lea.vmem %s1422_s11, 128  ;;  %s1224_s18 = smov [#allocation2]  }
  0x68   : > { %p1080_p0 = scmp.ne.s32.totalorder %s1422_s11, %s1079_s17  ;;  %s1084_s19 = sshll.u32 %s1224_s18, 4  ;;  %s1085_s19 = int_to_ptr.vmem [resolvable:$false] %s1084_s19 }
  0x69   : > { %s1086_s3 = scalar_lea.vmem %s1085_s19, 256  ;;  %p1087_p4 = scmp.lt.s32.totalorder %s1422_s11, %s1085_s19 }
  0x6a   : > { %p1082_p1 = pnand %p1080_p0, %p1066_p2  ;;  %p1088_p6 = scmp.lt.s32.totalorder %s1086_s3, %s1079_s17 }
  0x6c   : > { %p1083_p9 = pneg %p1082_p1  ;;  %p1089_p10 = por %p1088_p6, %p1087_p4 }
  0x6e   : > { %p1090_p3 = pnand %p1089_p10, %p1083_p9 }
  0x70   : > { %1093 = shalt.err (!%p1090_p3)
}
  0x71   : > { %s1225_s28 = smov 64   ;;  %s1226_s16 = smov 4  }
  0x72   : > { %938 = dma.hbm_to_vmem [thread:$0]  (!%p1418_p12), %s1413_s20, 128, %s1422_s11, %s1424_s15, %s1225_s28, %s1225_s28, %s1226_s16  }
  0x73   : > { %s1615_s9 = sshll.u32 %s1214_s25, 7  ;;  %s285_s3 = scalar_lea.vmem [#allocation5], %s1402_s12 }
  0x74   : > { %s1460_s19 = scalar_lea.hbm %s1589_s1, %s1615_s9  ;;  %s294_s0 = sshll.u32 %s285_s3, 4  ;;  %s1464_s0 = int_to_ptr.vmem [resolvable:$true] %s294_s0 }
  0x75   : > { %s281_s5 = sand.u32 1, %s1218_s26   ;;  %s1094_s8 = scalar_lea.hbm %s1460_s19, 128 }
  0x76   : > { %s1466_s14 = scalar_lea.sflag [#allocation6], %s281_s5  ;;  %p1095_p4 = scmp.ne.s32.totalorder %s1460_s19, %s1094_s8 }
  0x77   : > { %s1099_s15 = scalar_lea.hbm %s1589_s1, 256  ;;  %p1100_p5 = scmp.lt.u32.totalorder %s1460_s19, %s1589_s1 }
  0x78   : > { %p1097_p9 = pnand %p1095_p4, %p1066_p2  ;;  %p1101_p7 = scmp.lt.u32.totalorder %s1099_s15, %s1094_s8 }
  0x79   : > { %p1103_p0 = scmp.lt.u32.totalorder %s1094_s8, %s1460_s19 }
  0x7a   : > { %p1098_p13 = pneg %p1097_p9  ;;  %p1102_p11 = por %p1101_p7, %p1100_p5 }
  0x7c   : > { %p1104_p1 = por %p1103_p0, %p1102_p11 }
  0x7e   : > { %p1105_p6 = pnand %p1104_p1, %p1098_p13 }
  0x80   : > { %1108 = shalt.err (!%p1105_p6)
}
  0x81   : > { %s1109_s5 = scalar_lea.vmem %s1464_s0, 128  ;;  %s1227_s12 = smov [#allocation5]  }
  0x82   : > { %p1110_p10 = scmp.ne.s32.totalorder %s1464_s0, %s1109_s5  ;;  %s1114_s18 = sshll.u32 %s1227_s12, 4  ;;  %s1115_s18 = int_to_ptr.vmem [resolvable:$false] %s1114_s18 }
  0x83   : > { %s1116_s3 = scalar_lea.vmem %s1115_s18, 256  ;;  %p1117_p9 = scmp.lt.s32.totalorder %s1464_s0, %s1115_s18 }
  0x84   : > { %p1112_p3 = pnand %p1110_p10, %p1066_p2  ;;  %p1118_p5 = scmp.lt.s32.totalorder %s1116_s3, %s1109_s5 }
  0x86   : > { %p1113_p4 = pneg %p1112_p3  ;;  %p1119_p7 = por %p1118_p5, %p1117_p9 }
  0x88   : > { %p1120_p11 = pnand %p1119_p7, %p1113_p4 }
  0x8a   : > { %1123 = shalt.err (!%p1120_p11)
}
  0x8b   : > { %941 = dma.hbm_to_vmem [thread:$0]  (!%p1418_p12), %s1460_s19, 128, %s1464_s0, %s1466_s14, %s1225_s28, %s1225_s28, %s1226_s16  }
  0x8c   : > { %312 = sbr.rel (%p1316_p8) target bundleno = 626 (0x272), region = 44  ;;  %s1498_s8 = sand.u32 (!%p1316_p8), 1, %s1202_s22  }
  0x8d   : > { %s759_s20 = sshll.u32 (!%p1316_p8), %s1498_s8, 3  ;;  %s315_s11 = scalar_lea.sflag (!%p1316_p8), [#allocation3], %s1498_s8 }
  0x8e   : > { %s1502_s15 = scalar_lea.vmem (!%p1316_p8), [#allocation2], %s759_s20  ;;  %p1616_p2 = scmp.ne.s32.totalorder (!%p1316_p8), %s1603_s29, 0 }
  0x93   : > { %1177 = dma.done.wait (%p1616_p2), %s315_s11, 128  }
  0x94   : > { %1179 = vsyncadd (%p1616_p2), %s315_s11, 4294967168  ;;  %s323_s0 = sand.u32 1, %s1297_s27   ;;  %s327_s14 = scalar_lea.vmem [#allocation5], %s759_s20 }
  0x95   : > { %s324_s7 = scalar_lea.sflag [#allocation6], %s323_s0 }
  0x96   : > { %1181 = dma.done.wait (%p1616_p2), %s324_s7, 128  }
  0x97   : > { %1183 = vsyncadd (%p1616_p2), %s324_s7, 4294967168  ;;  %p1617_p8 = scmp.eq.s32.totalorder %s1297_s27, 0 }
  0x99   : > { %1185 = dma.done.wait (%p1617_p8), [#allocation6], 1024   ;;  %p1618_p12 = pmov %p1617_p8 }
  0x9a   : > { %p1619_p13 = pmov %p1617_p8 }
  0x9b   : > { %1187 = vsyncadd (%p1618_p12), [#allocation6], 4294966272 }
  0x9c   : > { %1189 = dma.done.wait (%p1619_p13), [#allocation9], 2048   ;;  %p1620_p0 = pmov %p1617_p8 }
  0x9d   : > { %v382_v0 = vld [vmem:[#allocation7] sm:$0xff]  ;;  %v383_v1 = vld [vmem:[#allocation7 + $0x8] sm:$0xff]  ;;  %v384_v2 = vld [vmem:[#allocation7 + $0x10] sm:$0xff]  ;;  %vm397_vm0 = vcmask 523264   ;;  %p374_p1 = scmp.lt.s32.totalorder %s1210_s24, 1  ;;  %s763_s13 = sshll.u32 %s1498_s8, 4 }
  0x9e   : > { %1191 = vsyncadd (%p1620_p0), [#allocation9], 4294965248  ;;  %v866_v3 = vpack.c.bf16 %v383_v1, %v382_v0  ;;  %v385_v4 = vld [vmem:[#allocation7 + $0x18] sm:$0xff]  ;;  %v386_v6 = vld [vmem:[#allocation7 + $0x20] sm:$0xff]  ;;  %s371_s17 = scalar_lea.vmem [#allocation10], %s763_s13  ;;  %s775_s12 = sshll.u32 %s1210_s24, 8 }
  0x9f   : > { %v870_v5 = vpack.c.bf16 %v385_v4, %v384_v2  ;;  %v387_v7 = vld [vmem:[#allocation7 + $0x28] sm:$0xff]  ;;  %v777_v8 = vld [vmem:[%s327_s14] sm:$0xff]   ;;  %v485_v10 = vld [vmem:[#allocation8] sm:$0xff]  ;;  %s375_s28 = scalar_select %p374_p1, %s1210_s24, 1 }
  0xa0   : > { %867 = vmatprep.subr.bf16.mxu0 %v866_v3  ;;  %v778_v9 = vunpack.c.l.bf16 %v777_v8  ;;  %v486_v11 = vld [vmem:[#allocation8 + $0x8] sm:$0xff]  ;;  %v487_v12 = vld [vmem:[#allocation8 + $0x10] sm:$0xff]  ;;  %v488_v14 = vld [vmem:[#allocation8 + $0x18] sm:$0xff]  ;;  %v874_v15 = vpack.c.bf16 %v387_v7, %v386_v6  ;;  %v779_v28 = vunpack.c.h.bf16 %v777_v8  ;;  %s605_s5 = sshll.u32 %s371_s17, 4  ;;  %s1539_s20 = scalar_lea.hbm %s1594_s6, %s775_s12  ;;  %s1534_s5 = int_to_ptr.vmem [resolvable:$true] %s605_s5 }
  0xa1   : > { %869 = vmatpush3.bf16.msra.mxu0 %v866_v3  ;;  %v882_v13 = vpack.c.bf16 %v486_v11, %v485_v10  ;;  %v886_v16 = vpack.c.bf16 %v488_v14, %v487_v12  ;;  %v489_v17 = vld [vmem:[#allocation8 + $0x20] sm:$0xff]  ;;  %v490_v18 = vld [vmem:[#allocation8 + $0x28] sm:$0xff]  ;;  %v388_v19 = vld [vmem:[#allocation7 + $0x30] sm:$0xff]  ;;  %s376_s9 = scalar_lea.vmem %s1590_s2, %s375_s28  ;;  %s590_s11 = scalar_lea.sflag [#allocation4], %s1498_s8 }
  0xa2   : > { %871 = vmatprep.subr.bf16.mxu0 %v870_v5  ;;  %828 = vmatprep.mubr.msk.f32.mxu0 %vm397_vm0, %v778_v9  ;;  %v389_v20 = vld [vmem:[#allocation7 + $0x38] sm:$0xff]  ;;  %v890_v21 = vpack.c.bf16 %v490_v18, %v489_v17  ;;  %v491_v23 = vld [vmem:[#allocation8 + $0x30] sm:$0xff]  ;;  %v493_v26 = vld [vmem:[#allocation8 + $0x40] sm:$0xff]  ;;  %p1621_p10 = scmp.ne.s32.totalorder %s1611_s10, 0  ;;  %s1228_s24 = smov [#allocation10]  }
  0xa3   : > { %883 = vmatprep.subr.bf16.mxu1 %v882_v13  ;;  %v878_v22 = vpack.c.bf16 %v389_v20, %v388_v19  ;;  %v492_v24 = vld [vmem:[#allocation8 + $0x38] sm:$0xff]  ;;  %v494_v27 = vld [vmem:[#allocation8 + $0x48] sm:$0xff]  ;;  %v495_v30 = vld [vmem:[#allocation8 + $0x50] sm:$0xff]  ;;  %s1128_s0 = sshll.u32 %s1228_s24, 4  ;;  %s1129_s0 = int_to_ptr.vmem [resolvable:$false] %s1128_s0 }
  0xa4   : > { %885 = vmatpush3.bf16.msra.mxu1 %v882_v13  ;;  %v894_v25 = vpack.c.bf16 %v492_v24, %v491_v23  ;;  %v898_v29 = vpack.c.bf16 %v494_v27, %v493_v26  ;;  %v496_v31 = vld [vmem:[#allocation8 + $0x58] sm:$0xff]  ;;  %v497_v33 = vld [vmem:[#allocation8 + $0x60] sm:$0xff]  ;;  %v498_v34 = vld [vmem:[#allocation8 + $0x68] sm:$0xff]  ;;  %s1130_s7 = scalar_lea.vmem %s1129_s0, 512  ;;  %p1131_p9 = scmp.lt.s32.totalorder %s1534_s5, %s1129_s0 }
  0xa5   : > { %873 = vmatpush3.bf16.msra.mxu0 %v870_v5  ;;  %887 = vmatprep.subr.bf16.mxu1 %v886_v16  ;;  %v902_v32 = vpack.c.bf16 %v496_v31, %v495_v30  ;;  %v906_v35 = vpack.c.bf16 %v498_v34, %v497_v33  ;;  %v499_v36 = vld [vmem:[#allocation8 + $0x70] sm:$0xff]  ;;  %v500_v37 = vld [vmem:[#allocation8 + $0x78] sm:$0xff]  ;;  %v764_v39 = vld [vmem:[%s1592_s4] ss:$0 sm:$0xff] }
  0xa6   : > { %875 = vmatprep.subr.bf16.mxu0 %v874_v15  ;;  %v910_v38 = vpack.c.bf16 %v500_v37, %v499_v36  ;;  %v781_v46 = vld [vmem:[%s1502_s15] sm:$0xff]   ;;  %s1124_s15 = scalar_lea.vmem %s1534_s5, 256 }
  0xa7   : > { %v783_v47 = vunpack.c.h.bf16 %v781_v46  ;;  %v782_v48 = vunpack.c.l.bf16 %v781_v46  ;;  %v767_v50 = vld [vmem:[%s376_s9] ss:$0 sm:$0xff]  ;;  %p1125_p6 = scmp.ne.s32.totalorder %s1534_s5, %s1124_s15  ;;  %p1132_p5 = scmp.lt.s32.totalorder %s1130_s7, %s1124_s15 }
  0xa8   : > { %889 = vmatpush3.bf16.msra.mxu1 %v886_v16 }
  0xa9   : > { %877 = vmatpush3.bf16.msra.mxu0 %v874_v15  ;;  %891 = vmatprep.subr.bf16.mxu1 %v890_v21  ;;  %p1126_p3 = pnand %p1125_p6, %p1621_p10  ;;  %p1133_p7 = por %p1132_p5, %p1131_p9 }
  0xaa   : > { %879 = vmatprep.subr.bf16.mxu0 %v878_v22 }
  0xab   : > { %p1127_p4 = pneg %p1126_p3 }
  0xac   : > { %893 = vmatpush3.bf16.msra.mxu1 %v890_v21 }
  0xad   : > { %881 = vmatpush3.bf16.msra.mxu0 %v878_v22  ;;  %895 = vmatprep.subr.bf16.mxu1 %v894_v25  ;;  %p1134_p11 = pnand %p1133_p7, %p1127_p4 }
  0xb0   : > { %829 = vmatmul.mubr.msk.f32.vlgmr.msra.gmra.mrb[0].mxu0 %vm397_vm0, %v779_v28  ;;  %897 = vmatpush3.bf16.msra.mxu1 %v894_v25 }
  0xb1   : > { %899 = vmatprep.subr.bf16.mxu1 %v898_v29 }
  0xb4   : > { %901 = vmatpush3.bf16.msra.mxu1 %v898_v29 }
  0xb5   : > { %903 = vmatprep.subr.bf16.mxu1 %v902_v32 }
  0xb8   : > { %905 = vmatpush3.bf16.msra.mxu1 %v902_v32 }
  0xb9   : > { %907 = vmatprep.subr.bf16.mxu1 %v906_v35 }
  0xbc   : > { %909 = vmatpush3.bf16.msra.mxu1 %v906_v35 }
  0xbd   : > { %911 = vmatprep.subr.bf16.mxu1 %v910_v38 }
  0xc0   : > { %913 = vmatpush3.bf16.msra.mxu1 %v910_v38 }
 0x183   : > { %v830_v40 = vpop.f32.mrb[0].mxu0 }
 0x184   : > { %v476_v41 = vadd.f32 %v830_v40, %v764_v39  ;;  %v470_v42 = vpop.f32.mrb[1].mxu0 }
 0x185   : > { %v471_v43 = vadd.f32 %v764_v39, %v470_v42 }
 0x186   : > { %v480_v45 = vmax.f32 %v476_v41, 0.0 }
 0x187   : > { %v479_v44 = vmax.f32 %v471_v43, 0.0 }
 0x189   : > { %863 = vmatprep.mubr.f32.mxu1 %v479_v44 }
 0x18a   : > { %864 = vmatmul.mubr.f32.vlgmr.msra.gmra.mrb[0].mxu1 %v480_v45 }
 0x25d   : > { %v865_v49 = vpop.f32.mrb[0].mxu1 }
 0x25e   : > { %v577_v51 = vadd.f32 %v865_v49, %v783_v47  ;;  %v567_v52 = vpop.f32.mrb[1].mxu1 }
 0x25f   : > { %v576_v53 = vadd.f32 %v782_v48, %v567_v52 }
 0x260   : > { %v586_v54 = vadd.f32 %v767_v50, %v577_v51 }
 0x261   : > { %v585_v55 = vadd.f32 %v767_v50, %v576_v53 }
 0x262   : > { %588 = vst [vmem:[%s371_s17 + $0x8] sm:$0xff] %v586_v54 }
 0x263   : > { %587 = vst [vmem:[%s371_s17] sm:$0xff] %v585_v55 }
 0x264   : > { %1137 = shalt.err (!%p1134_p11)
}
 0x265   : > { %s1138_s14 = scalar_lea.hbm %s1539_s20, 256  ;;  %s1142_s13 = scalar_lea.hbm %s1594_s6, 512 }
 0x266   : > { %p1139_p2 = scmp.ne.s32.totalorder %s1539_s20, %s1138_s14  ;;  %p1143_p13 = scmp.lt.u32.totalorder %s1539_s20, %s1594_s6 }
 0x267   : > { %p1144_p0 = scmp.lt.u32.totalorder %s1142_s13, %s1138_s14  ;;  %p1146_p6 = scmp.lt.u32.totalorder %s1138_s14, %s1539_s20 }
 0x268   : > { %p1140_p8 = pnand %p1139_p2, %p1621_p10 }
 0x269   : > { %p1145_p1 = por %p1144_p0, %p1143_p13 }
 0x26a   : > { %p1141_p12 = pneg %p1140_p8 }
 0x26b   : > { %p1147_p3 = por %p1146_p6, %p1145_p1 }
 0x26d   : > { %p1148_p4 = pnand %p1147_p3, %p1141_p12 }
 0x26f   : > { %1151 = shalt.err (!%p1148_p4)
}
 0x270   : > { %s1229_s19 = smov 128   ;;  %s1230_s9 = smov 8  }
 0x271   : > { %926 = dma.vmem_to_hbm [thread:$0]  (%p1621_p10), %s1534_s5, 256, %s1539_s20, %s590_s11, %s1229_s19, %s1229_s19, %s1230_s9  }
 0x272 PF: > { %s620_s17 = sand.u32 1, %s1198_s21   ;;  %p1622_p9 = scmp.ne.s32.totalorder %s1604_s30, 0 }
 0x273   : > { %p1623_p5 = scmp.ge.s32.totalorder %s1218_s26, 2  ;;  %s621_s12 = scalar_lea.sflag [#allocation4], %s620_s17 }
 0x275   : > { %p943_p7 = pnand %p1623_p5, %p1622_p9 }
 0x277   : > { %1193 = dma.done.wait (!%p943_p7), %s621_s12, 256  }
 0x278   : > { %1195 = vsyncadd (!%p943_p7), %s621_s12, 4294967040  ;;  %s26_s26 = sadd.s32 1, %s1218_s26   ;;  %s1624_s18 = sld [smem:[#allocation17_spill]] }
 0x279   : > { %p23_p11 = scmp.ge.s32.totalorder %s26_s26, 4   ;;  %s1625_s10 = sld [smem:[#allocation16_spill]] }
 0x27a   : > { %s1626_s21 = smov %s1202_s22  ;;  %s1627_s22 = smov %s1206_s23 }
 0x27b   : > { %s1629_s24 = smov %s1214_s25  ;;  %25 = sbr.rel (!%p23_p11) target bundleno = 13 (0xd), region = 113 }
 0x27e   : > { %s1628_s23 = smov %s1624_s18 }
 0x27f   : > { %s1630_s25 = smov %s1625_s10 }
 0x282   :  { %626 = vsyncpa [#allocation3], 1 }
 0x283   :  { %628 = vsyncpa [#allocation3 + $0x1], 1 }
 0x284   :  { %629 = vsyncpa [#allocation6], 1 }
 0x285   :  { %631 = vsyncpa [#allocation6 + $0x1], 1 }
 0x286   :  { %632 = vsyncpa [#allocation9], 1 }
 0x287   :  { %633 = vsyncpa [#allocation4], 1 }
 0x288   :  { %635 = vsyncpa [#allocation4 + $0x1], 1 }

</bundles_post_ra>
